<compile_context>
chip_gen: v5e
topology: v5e:2x2
jax: 0.10.0
libtpu: 0.0.40
codegen_flags: <defaults>
</compile_context>

<pallas_src>
import functools

import jax
import jax.numpy as jnp
from jax import lax
from jax.experimental import pallas as pl
from jax.experimental.pallas import tpu as pltpu

_BN_EPS = 1e-5
_LANE = 128  # lane-dense padding of hidden D_out (v5e tile; see TODO for 256)


def _round_up(x, m):
    return ((x + m - 1) // m) * m


def _apply_activation(y, activation):
    if activation == "relu":
        return jnp.maximum(y, 0.0)
    if activation == "sigmoid":
        return jax.nn.sigmoid(y)
    if activation == "leakyrelu":
        # The reference module uses nn.LeakyReLU(0.2).
        return jnp.where(y >= 0.0, y, 0.2 * y)
    if activation == "tanh":
        return jnp.tanh(y)
    raise ValueError("Unknown activation type %s" % activation)


def _encoder_fused_kernel(*refs, schema, activation):
    """Whole-encoder forward pass in a single kernel body.

    refs = [x] + flat(prepared params, per `schema`) + [o].
    schema: per-layer tuple of tags among ("w", "b", "bn", "act").
    Intermediate activations stay resident in VMEM/vregs (no HBM round trip).
    """
    x_ref = refs[0]
    o_ref = refs[-1]
    p = refs[1:-1]

    h = x_ref[...].astype(jnp.float32)
    idx = 0
    for layer in schema:
        w = p[idx][...]
        idx += 1
        # MXU matmul; operands in w's dtype (bf16 by default), f32 accumulate.
        y = jnp.dot(h.astype(w.dtype), w, preferred_element_type=jnp.float32)
        if "b" in layer:
            y = y + p[idx][...]
            idx += 1
        if "bn" in layer:
            gamma = p[idx][...]
            beta = p[idx + 1][...]
            idx += 2
            # Training-mode BatchNorm1d over the full (resident) batch.
            # Single pass: mean and E[y^2] together, var = E[y^2] - mean^2.
            mean = jnp.mean(y, axis=0, keepdims=True)
            mean_sq = jnp.mean(y * y, axis=0, keepdims=True)
            var = jnp.maximum(mean_sq - mean * mean, 0.0)
            scale = gamma * lax.rsqrt(var + _BN_EPS)   # rsqrt -> EUP slot
            shift = beta - mean * scale
            y = y * scale + shift                      # one fused scale/shift
        if "act" in layer:
            y = _apply_activation(y, activation)
        h = y
    o_ref[...] = h.astype(o_ref.dtype)


def prepare_encoder_params(params, *, activation="relu", batchnorm=True,
                           mxu_dtype=jnp.bfloat16, lane=_LANE):
    """One-time parameter preparation (hoisted out of the per-call path).

    params: list of dicts with 'w' (Din, Dout), 'b' (1, Dout) and, for hidden
    layers when batchnorm is on, 'gamma'/'beta' (1, Dout).

    Padding rules:
      * input feature dim and final output dim: UNPADDED.
      * every hidden D_out: zero-padded up to a multiple of `lane` so matmul
        outputs are lane-dense; the matching D_in rows of the NEXT layer's
        weight are zero-padded too, which also neutralises activation(0) != 0
        cases (e.g. sigmoid -> 0.5 in padded columns).
    """
    n_layers = len(params)
    dims = [params[0]["w"].shape[0]] + [p["w"].shape[1] for p in params]
    dims_p = ([dims[0]]
              + [_round_up(d, lane) for d in dims[1:-1]]
              + [dims[-1]])

    flat = []
    schema = []
    for i, prm in enumerate(params):
        din, dout = prm["w"].shape
        din_p, dout_p = dims_p[i], dims_p[i + 1]
        is_last = (i == n_layers - 1)

        w = jnp.pad(prm["w"].astype(jnp.float32),
                    ((0, din_p - din), (0, dout_p - dout))).astype(mxu_dtype)
        layer = ["w"]
        flat.append(w)

        use_bias = is_last or not batchnorm   # hidden bias cancels under BN
        if use_bias:
            b = jnp.pad(prm["b"].astype(jnp.float32).reshape(1, dout),
                        ((0, 0), (0, dout_p - dout)))
            layer.append("b")
            flat.append(b)

        if not is_last:
            if batchnorm:
                g = jnp.pad(prm["gamma"].astype(jnp.float32).reshape(1, dout),
                            ((0, 0), (0, dout_p - dout)), constant_values=1.0)
                be = jnp.pad(prm["beta"].astype(jnp.float32).reshape(1, dout),
                             ((0, 0), (0, dout_p - dout)))
                layer.append("bn")
                flat += [g, be]
            layer.append("act")
        schema.append(tuple(layer))

    return {
        "flat": tuple(flat),
        "schema": tuple(schema),
        "dims": tuple(dims),
        "dims_p": tuple(dims_p),
        "activation": activation,
    }


def encoder_forward(x, prepared):
    """Per-call path: only x-dependent work (one fused pallas_call)."""
    flat = prepared["flat"]
    schema = prepared["schema"]
    dims = prepared["dims"]
    dims_p = prepared["dims_p"]
    activation = prepared["activation"]

    n, d_in = x.shape
    assert d_in == dims[0], "input feature dim mismatch"
    d_out = dims[-1]

    # Advisory cost estimate (padded dims -> slight overestimate, harmless).
    flops = 0
    transcendentals = 0
    bytes_accessed = n * d_in * x.dtype.itemsize + n * d_out * 4
    for i, layer in enumerate(schema):
        flops += 2 * n * dims_p[i] * dims_p[i + 1]
        if "act" in layer and activation in ("sigmoid", "tanh"):
            transcendentals += n * dims_p[i + 1]
    param_bytes = 0
    for a in flat:
        param_bytes += a.size * a.dtype.itemsize
    bytes_accessed += param_bytes

    # Explicit VMEM budget from the actual resident footprint:
    # x + all prepared params + output + two live f32 activation slabs.
    act_bytes = 2 * n * max(dims_p[1:]) * 4
    resident = (n * d_in * x.dtype.itemsize + param_bytes
                + n * d_out * 4 + act_bytes)
    vmem_bytes = min(64 << 20, max(8 << 20, 2 * resident + (2 << 20)))

    kernel = functools.partial(_encoder_fused_kernel, schema=schema,
                               activation=activation)
    vspec = pl.BlockSpec(memory_space=pltpu.MemorySpace.VMEM)

    out = pl.pallas_call(
        kernel,
        out_shape=jax.ShapeDtypeStruct((n, d_out), jnp.float32),
        in_specs=[vspec] * (1 + len(flat)),
        out_specs=vspec,
        compiler_params=pltpu.CompilerParams(vmem_limit_bytes=int(vmem_bytes)),
        cost_estimate=pl.CostEstimate(flops=int(flops),
                                      transcendentals=int(transcendentals),
                                      bytes_accessed=int(bytes_accessed)),
    )(x, *flat)
    return out


def init_encoder_params(key, encoder_dim):
    """Deterministic init mirroring nn.Linear / nn.BatchNorm1d shapes."""
    params = []
    n_layers = len(encoder_dim) - 1
    for i in range(n_layers):
        d_in, d_out = encoder_dim[i], encoder_dim[i + 1]
        key, kw, kb = jax.random.split(key, 3)
        bound = 1.0 / jnp.sqrt(jnp.float32(d_in))
        w = jax.random.uniform(kw, (d_in, d_out), jnp.float32, -bound, bound)
        b = jax.random.uniform(kb, (1, d_out), jnp.float32, -bound, bound)
        gamma = jnp.ones((1, d_out), jnp.float32)   # BatchNorm1d weight
        beta = jnp.zeros((1, d_out), jnp.float32)   # BatchNorm1d bias
        params.append({"w": w, "b": b, "gamma": gamma, "beta": beta})
    return params


def _reference_forward(x, params, *, activation="relu", batchnorm=True,
                       mxu_dtype=jnp.float32):
    # Pure-JAX reference (same training-mode BN semantics as nn.BatchNorm1d).
    # mxu_dtype emulates the kernel's matmul-operand dtype for tight checks.
    # TODO(synk): running_mean/running_var buffer updates of nn.BatchNorm1d
    # are not tracked (forward uses batch statistics, i.e. training mode).
    n_layers = len(params)
    h = x.astype(jnp.float32)
    for i, p in enumerate(params):
        y = jnp.dot(h.astype(mxu_dtype), p["w"].astype(mxu_dtype),
                    preferred_element_type=jnp.float32) + p["b"].reshape(1, -1)
        if i < n_layers - 1:
            if batchnorm:
                mean = jnp.mean(y, axis=0, keepdims=True)
                var = jnp.mean((y - mean) ** 2, axis=0, keepdims=True)
                y = (y - mean) / jnp.sqrt(var + _BN_EPS)
                y = y * p["gamma"] + p["beta"]
            y = _apply_activation(y, activation)
        h = y
    return h


if __name__ == "__main__":
    # Small shapes consistent with the module: encoder_dim = [32, 64, 48, 16].
    # Batch 64 (rather than 8) so the MXU sees a few full sublane groups,
    # while staying small.  The batch axis is never tiled (exact BN stats).
    encoder_dim = [32, 64, 48, 16]
    batch = 64

    key = jax.random.PRNGKey(0)
    key, kx = jax.random.split(key)
    x = jax.random.normal(kx, (batch, encoder_dim[0]), jnp.float32)
    params = init_encoder_params(key, encoder_dim)

    # --- Config A: module defaults (relu + batchnorm), f32 MXU operands.
    prep_f32 = prepare_encoder_params(params, activation="relu",
                                      batchnorm=True, mxu_dtype=jnp.float32)
    out = jax.block_until_ready(encoder_forward(x, prep_f32))
    ref = _reference_forward(x, params, activation="relu", batchnorm=True)
    assert out.shape == (batch, encoder_dim[-1])
    assert jnp.allclose(out, ref, atol=1e-4, rtol=1e-4), \
        "mismatch vs f32 reference (relu+bn, f32 MXU)"

    # --- Config B: relu + batchnorm with bf16 MXU operands (default, faster).
    prep_bf16 = prepare_encoder_params(params, activation="relu",
                                       batchnorm=True)  # mxu_dtype=bf16
    out_b = jax.block_until_ready(encoder_forward(x, prep_bf16))
    ref_b = _reference_forward(x, params, activation="relu", batchnorm=True,
                               mxu_dtype=jnp.bfloat16)
    assert jnp.allclose(out_b, ref_b, atol=1e-3, rtol=1e-3), \
        "mismatch vs bf16-emulated reference (relu+bn)"
    assert jnp.allclose(out_b, ref, atol=1e-1, rtol=1e-1), \
        "bf16 output too far from f32 semantics (relu+bn)"

    # --- Config C: no-BN / transcendental path (tanh), bf16 MXU operands.
    prep_t = prepare_encoder_params(params, activation="tanh", batchnorm=False)
    out_t = jax.block_until_ready(encoder_forward(x, prep_t))
    ref_t = _reference_forward(x, params, activation="tanh", batchnorm=False,
                               mxu_dtype=jnp.bfloat16)
    assert jnp.allclose(out_t, ref_t, atol=1e-3, rtol=1e-3), \
        "mismatch vs bf16-emulated reference (tanh, no bn)"

    print("KERNEL_OK")
</pallas_src>

<mosaic_0001>
module attributes {stable_mosaic.version = 11 : i64} {
  func.func @_encoder_fused_kernel(%arg0: memref<64x32xf32, #tpu.memory_space<vmem>>, %arg1: memref<32x128xf32, #tpu.memory_space<vmem>>, %arg2: memref<1x128xf32, #tpu.memory_space<vmem>>, %arg3: memref<1x128xf32, #tpu.memory_space<vmem>>, %arg4: memref<128x128xf32, #tpu.memory_space<vmem>>, %arg5: memref<1x128xf32, #tpu.memory_space<vmem>>, %arg6: memref<1x128xf32, #tpu.memory_space<vmem>>, %arg7: memref<128x16xf32, #tpu.memory_space<vmem>>, %arg8: memref<1x16xf32, #tpu.memory_space<vmem>>, %arg9: memref<64x16xf32, #tpu.memory_space<vmem>>) attributes {dimension_semantics = [], scalar_prefetch = 0 : i64, scratch_operands = 0 : i64, tpu.core_type = #tpu.core_type<tc>} {
    %c0 = arith.constant 0 : index
    %c0_0 = arith.constant 0 : index
    %0 = vector.load %arg0[%c0, %c0_0] : memref<64x32xf32, #tpu.memory_space<vmem>>, vector<64x32xf32>
    %c0_1 = arith.constant 0 : index
    %c0_2 = arith.constant 0 : index
    %1 = vector.load %arg1[%c0_1, %c0_2] : memref<32x128xf32, #tpu.memory_space<vmem>>, vector<32x128xf32>
    %cst = arith.constant dense<0.000000e+00> : vector<64x128xf32>
    %2 = tpu.matmul %0, %1, %cst {dimension_numbers = #tpu.dot_dimension_numbers<[1], [0], [0], [1], [0, 0, 1, 1], [], []>} : vector<64x32xf32>, vector<32x128xf32>, vector<64x128xf32> -> vector<64x128xf32>
    %c0_3 = arith.constant 0 : index
    %c0_4 = arith.constant 0 : index
    %3 = vector.load %arg2[%c0_3, %c0_4] : memref<1x128xf32, #tpu.memory_space<vmem>>, vector<1x128xf32>
    %c0_5 = arith.constant 0 : index
    %c0_6 = arith.constant 0 : index
    %4 = vector.load %arg3[%c0_5, %c0_6] : memref<1x128xf32, #tpu.memory_space<vmem>>, vector<1x128xf32>
    %cst_7 = arith.constant dense<0.000000e+00> : vector<128xf32>
    %5 = vector.multi_reduction <add>, %2, %cst_7 [0] : vector<64x128xf32> to vector<128xf32>
    %6 = vector.shape_cast %5 : vector<128xf32> to vector<1x128xf32>
    %cst_8 = arith.constant 6.400000e+01 : f32
    %7 = vector.broadcast %cst_8 : f32 to vector<1x128xf32>
    %8 = arith.divf %6, %7 : vector<1x128xf32>
    %9 = arith.mulf %2, %2 : vector<64x128xf32>
    %cst_9 = arith.constant dense<0.000000e+00> : vector<128xf32>
    %10 = vector.multi_reduction <add>, %9, %cst_9 [0] : vector<64x128xf32> to vector<128xf32>
    %11 = vector.shape_cast %10 : vector<128xf32> to vector<1x128xf32>
    %cst_10 = arith.constant 6.400000e+01 : f32
    %12 = vector.broadcast %cst_10 : f32 to vector<1x128xf32>
    %13 = arith.divf %11, %12 : vector<1x128xf32>
    %14 = arith.mulf %8, %8 : vector<1x128xf32>
    %15 = arith.subf %13, %14 : vector<1x128xf32>
    %cst_11 = arith.constant 0.000000e+00 : f32
    %16 = vector.broadcast %cst_11 : f32 to vector<1x128xf32>
    %17 = arith.maximumf %15, %16 : vector<1x128xf32>
    %cst_12 = arith.constant 9.99999974E-6 : f32
    %18 = vector.broadcast %cst_12 : f32 to vector<1x128xf32>
    %19 = arith.addf %17, %18 : vector<1x128xf32>
    %20 = math.rsqrt %19 : vector<1x128xf32>
    %21 = arith.mulf %3, %20 : vector<1x128xf32>
    %22 = arith.mulf %8, %21 : vector<1x128xf32>
    %23 = arith.subf %4, %22 : vector<1x128xf32>
    %24 = vector.broadcast %21 : vector<1x128xf32> to vector<64x128xf32>
    %25 = arith.mulf %2, %24 : vector<64x128xf32>
    %26 = vector.broadcast %23 : vector<1x128xf32> to vector<64x128xf32>
    %27 = arith.addf %25, %26 : vector<64x128xf32>
    %cst_13 = arith.constant 0.000000e+00 : f32
    %28 = vector.broadcast %cst_13 : f32 to vector<64x128xf32>
    %29 = arith.maximumf %27, %28 : vector<64x128xf32>
    %c0_14 = arith.constant 0 : index
    %c0_15 = arith.constant 0 : index
    %30 = vector.load %arg4[%c0_14, %c0_15] : memref<128x128xf32, #tpu.memory_space<vmem>>, vector<128x128xf32>
    %cst_16 = arith.constant dense<0.000000e+00> : vector<64x128xf32>
    %31 = tpu.matmul %29, %30, %cst_16 {dimension_numbers = #tpu.dot_dimension_numbers<[1], [0], [0], [1], [0, 0, 1, 1], [], []>} : vector<64x128xf32>, vector<128x128xf32>, vector<64x128xf32> -> vector<64x128xf32>
    %c0_17 = arith.constant 0 : index
    %c0_18 = arith.constant 0 : index
    %32 = vector.load %arg5[%c0_17, %c0_18] : memref<1x128xf32, #tpu.memory_space<vmem>>, vector<1x128xf32>
    %c0_19 = arith.constant 0 : index
    %c0_20 = arith.constant 0 : index
    %33 = vector.load %arg6[%c0_19, %c0_20] : memref<1x128xf32, #tpu.memory_space<vmem>>, vector<1x128xf32>
    %cst_21 = arith.constant dense<0.000000e+00> : vector<128xf32>
    %34 = vector.multi_reduction <add>, %31, %cst_21 [0] : vector<64x128xf32> to vector<128xf32>
    %35 = vector.shape_cast %34 : vector<128xf32> to vector<1x128xf32>
    %cst_22 = arith.constant 6.400000e+01 : f32
    %36 = vector.broadcast %cst_22 : f32 to vector<1x128xf32>
    %37 = arith.divf %35, %36 : vector<1x128xf32>
    %38 = arith.mulf %31, %31 : vector<64x128xf32>
    %cst_23 = arith.constant dense<0.000000e+00> : vector<128xf32>
    %39 = vector.multi_reduction <add>, %38, %cst_23 [0] : vector<64x128xf32> to vector<128xf32>
    %40 = vector.shape_cast %39 : vector<128xf32> to vector<1x128xf32>
    %cst_24 = arith.constant 6.400000e+01 : f32
    %41 = vector.broadcast %cst_24 : f32 to vector<1x128xf32>
    %42 = arith.divf %40, %41 : vector<1x128xf32>
    %43 = arith.mulf %37, %37 : vector<1x128xf32>
    %44 = arith.subf %42, %43 : vector<1x128xf32>
    %cst_25 = arith.constant 0.000000e+00 : f32
    %45 = vector.broadcast %cst_25 : f32 to vector<1x128xf32>
    %46 = arith.maximumf %44, %45 : vector<1x128xf32>
    %cst_26 = arith.constant 9.99999974E-6 : f32
    %47 = vector.broadcast %cst_26 : f32 to vector<1x128xf32>
    %48 = arith.addf %46, %47 : vector<1x128xf32>
    %49 = math.rsqrt %48 : vector<1x128xf32>
    %50 = arith.mulf %32, %49 : vector<1x128xf32>
    %51 = arith.mulf %37, %50 : vector<1x128xf32>
    %52 = arith.subf %33, %51 : vector<1x128xf32>
    %53 = vector.broadcast %50 : vector<1x128xf32> to vector<64x128xf32>
    %54 = arith.mulf %31, %53 : vector<64x128xf32>
    %55 = vector.broadcast %52 : vector<1x128xf32> to vector<64x128xf32>
    %56 = arith.addf %54, %55 : vector<64x128xf32>
    %cst_27 = arith.constant 0.000000e+00 : f32
    %57 = vector.broadcast %cst_27 : f32 to vector<64x128xf32>
    %58 = arith.maximumf %56, %57 : vector<64x128xf32>
    %c0_28 = arith.constant 0 : index
    %c0_29 = arith.constant 0 : index
    %59 = vector.load %arg7[%c0_28, %c0_29] : memref<128x16xf32, #tpu.memory_space<vmem>>, vector<128x16xf32>
    %cst_30 = arith.constant dense<0.000000e+00> : vector<64x16xf32>
    %60 = tpu.matmul %58, %59, %cst_30 {dimension_numbers = #tpu.dot_dimension_numbers<[1], [0], [0], [1], [0, 0, 1, 1], [], []>} : vector<64x128xf32>, vector<128x16xf32>, vector<64x16xf32> -> vector<64x16xf32>
    %c0_31 = arith.constant 0 : index
    %c0_32 = arith.constant 0 : index
    %61 = vector.load %arg8[%c0_31, %c0_32] : memref<1x16xf32, #tpu.memory_space<vmem>>, vector<1x16xf32>
    %62 = vector.broadcast %61 : vector<1x16xf32> to vector<64x16xf32>
    %63 = arith.addf %60, %62 : vector<64x16xf32>
    %c0_33 = arith.constant 0 : index
    %c0_34 = arith.constant 0 : index
    %64 = vector.load %arg9[%c0_33, %c0_34] : memref<64x16xf32, #tpu.memory_space<vmem>>, vector<64x16xf32>
    tpu.vector_store %arg9[%c0_33, %c0_34], %63 {strides = array<i32>} : memref<64x16xf32, #tpu.memory_space<vmem>>, vector<64x16xf32>,
    return
  }
}

</mosaic_0001>

<bundles_post_ra>
// kernel: tpu_custom_call.1
= control target key start
LH: loop header
LB: loop body
LE: loop exit
PB: predicated region body
PF: predicated region fallthrough
CT: control target
= control target key end

     0   :  { %vm44_vm0 = vcmask 261120   ;;  %v466_v19 = vmov 64.0   ;;  %vm405_vm8 = vcmask 130048   ;;  %s806_s1 = inlined_call_operand.vmem [shape: f32[32,128], index: 1, kind: input, shape index: {}]   ;;  %s807_s0 = inlined_call_operand.vmem [shape: f32[64,32], index: 0, kind: input, shape index: {}]   ;;  %s808_s4 = inlined_call_operand.vmem [shape: f32[128,128], index: 4, kind: input, shape index: {}]   ;;  %s809_s2 = inlined_call_operand.vmem [shape: f32[1,128], index: 2, kind: input, shape index: {}]   ;;  %s810_s3 = inlined_call_operand.vmem [shape: f32[1,128], index: 3, kind: input, shape index: {}]   ;;  %s811_s8 = inlined_call_operand.vmem [shape: f32[1,16], index: 8, kind: input, shape index: {}]   ;;  %s812_s7 = inlined_call_operand.vmem [shape: f32[128,16], index: 7, kind: input, shape index: {}]   ;;  %s813_s5 = inlined_call_operand.vmem [shape: f32[1,128], index: 5, kind: input, shape index: {}]   ;;  %s814_s6 = inlined_call_operand.vmem [shape: f32[1,128], index: 6, kind: input, shape index: {}]   ;;  %s815_s9 = inlined_call_operand.vmem [shape: f32[64,16], index: 9, kind: output, shape index: {}]  }
   0x1   :  { %v43_v0 = vld [vmem:[%s806_s1 + $0x18] sm:$0xff]  ;;  %v42_v1 = vld [vmem:[%s806_s1 + $0x10] sm:$0xff]  ;;  %v41_v2 = vld [vmem:[%s806_s1 + $0x8] sm:$0xff]  ;;  %460 = vrcp.f32 %v466_v19 }
   0x2   :  { %81 = vmatpush.msra.mxu0 %v43_v0  ;;  %v40_v3 = vld [vmem:[%s806_s1] sm:$0xff]  ;;  %v33_v5 = vld [vmem:[%s807_s0 + $0x8] sm:$0xff]  ;;  %v34_v6 = vld [vmem:[%s807_s0 + $0x10] sm:$0xff] }
   0x3   :  { %v32_v4 = vld [vmem:[%s807_s0] sm:$0xff]  ;;  %v35_v7 = vld [vmem:[%s807_s0 + $0x18] sm:$0xff]  ;;  %v37_v9 = vld [vmem:[%s807_s0 + $0x28] sm:$0xff] }
   0x4   :  { %82 = vmatpush.msra.mxu0 %v42_v1  ;;  %v36_v8 = vld [vmem:[%s807_s0 + $0x20] sm:$0xff]  ;;  %v38_v10 = vld [vmem:[%s807_s0 + $0x30] sm:$0xff]  ;;  %v39_v11 = vld [vmem:[%s807_s0 + $0x38] sm:$0xff] }
   0x5   :  { %v217_v26 = vld [vmem:[%s808_s4 + $0x78] sm:$0xff]  ;;  %v216_v32 = vld [vmem:[%s808_s4 + $0x70] sm:$0xff]  ;;  %v215_v36 = vld [vmem:[%s808_s4 + $0x68] sm:$0xff] }
   0x6   :  { %83 = vmatpush.msra.mxu0 %v41_v2  ;;  %218 = vmatpush.msra.mxu1 %v217_v26  ;;  %v214_v41 = vld [vmem:[%s808_s4 + $0x60] sm:$0xff]  ;;  %v213_v44 = vld [vmem:[%s808_s4 + $0x58] sm:$0xff]  ;;  %v212_v50 = vld [vmem:[%s808_s4 + $0x50] sm:$0xff] }
   0x7   :  { %426 = vmatpush.msra.mxu3 %v217_v26  ;;  %v461_v28 = vpop.eup %460  ;;  %v211_v53 = vld [vmem:[%s808_s4 + $0x48] sm:$0xff]  ;;  %v210_v57 = vld [vmem:[%s808_s4 + $0x40] sm:$0xff]  ;;  %v209_v60 = vld [vmem:[%s808_s4 + $0x38] sm:$0xff] }
   0x8   :  { %84 = vmatpush.msra.mxu0 %v40_v3  ;;  %219 = vmatpush.msra.mxu1 %v216_v32  ;;  %v126_v37 = vmul.f32 64.0, %v461_v28  ;;  %vm130_vm1 = vweird.f32 %v461_v28  ;;  %v208_v0 = vld [vmem:[%s808_s4 + $0x30] sm:$0xff]  ;;  %v207_v3 = vld [vmem:[%s808_s4 + $0x28] sm:$0xff] }
   0x9   :  { %418 = vmatmul.msk.f32.vlgmr.msra.gmra.mxu0 %vm44_vm0, %v32_v4  ;;  %427 = vmatpush.msra.mxu3 %v216_v32  ;;  %v204_v19 = vld [vmem:[%s808_s4 + $0x10] sm:$0xff] }
   0xa   :  { %220 = vmatpush.msra.mxu1 %v215_v36  ;;  %v127_v46 = vsub.f32 1.0, %v126_v37 }
   0xb   :  { %428 = vmatpush.msra.mxu3 %v215_v36 }
   0xc   :  { %221 = vmatpush.msra.mxu1 %v214_v41  ;;  %v128_v54 = vmul.f32 %v461_v28, %v127_v46 }
   0xd   :  { %429 = vmatpush.msra.mxu3 %v214_v41 }
   0xe   :  { %222 = vmatpush.msra.mxu1 %v213_v44  ;;  %v129_v61 = vadd.f32 %v461_v28, %v128_v54 }
   0xf   :  { %430 = vmatpush.msra.mxu3 %v213_v44 }
  0x10   :  { %223 = vmatpush.msra.mxu1 %v212_v50  ;;  %v634_v4 = vsel %vm130_vm1, %v461_v28, %v129_v61 }
  0x11   :  { %419 = vmatmul.msk.f32.gmra.mxu0 %vm44_vm0, %v33_v5  ;;  %431 = vmatpush.msra.mxu3 %v212_v50 }
  0x12   :  { %224 = vmatpush.msra.mxu1 %v211_v53 }
  0x13   :  { %432 = vmatpush.msra.mxu3 %v211_v53 }
  0x14   :  { %225 = vmatpush.msra.mxu1 %v210_v57 }
  0x15   :  { %433 = vmatpush.msra.mxu3 %v210_v57 }
  0x16   :  { %226 = vmatpush.msra.mxu1 %v209_v60 }
  0x17   :  { %434 = vmatpush.msra.mxu3 %v209_v60 }
  0x18   :  { %227 = vmatpush.msra.mxu1 %v208_v0 }
  0x19   :  { %420 = vmatmul.msk.f32.gmra.mxu0 %vm44_vm0, %v34_v6  ;;  %435 = vmatpush.msra.mxu3 %v208_v0 }
  0x1a   :  { %228 = vmatpush.msra.mxu1 %v207_v3 }
  0x1b   :  { %436 = vmatpush.msra.mxu3 %v207_v3 }
  0x21   :  { %421 = vmatmul.msk.f32.gmra.mxu0 %vm44_vm0, %v35_v7  ;;  %v206_v7 = vld [vmem:[%s808_s4 + $0x20] sm:$0xff] }
  0x22   :  { %229 = vmatpush.msra.mxu1 %v206_v7  ;;  %437 = vmatpush.msra.mxu3 %v206_v7 }
  0x29   :  { %422 = vmatmul.msk.f32.gmra.mxu0 %vm44_vm0, %v36_v8 }
  0x31   :  { %423 = vmatmul.msk.f32.gmra.mxu0 %vm44_vm0, %v37_v9 }
  0x39   :  { %424 = vmatmul.msk.f32.gmra.mxu0 %vm44_vm0, %v38_v10  ;;  %v205_v10 = vld [vmem:[%s808_s4 + $0x18] sm:$0xff] }
  0x3a   :  { %230 = vmatpush.msra.mxu1 %v205_v10  ;;  %438 = vmatpush.msra.mxu3 %v205_v10  ;;  %v359_v10 = vld [vmem:[%s812_s7 + $0x78] sm:$0xff] }
  0x3b   :  { %364 = vmatpush.msra.mxu2 %v359_v10 }
  0x3c   :  { %231 = vmatpush.msra.mxu1 %v204_v19  ;;  %439 = vmatpush.msra.mxu3 %v204_v19  ;;  %v358_v19 = vld [vmem:[%s812_s7 + $0x70] sm:$0xff] }
  0x3d   :  { %365 = vmatpush.msra.mxu2 %v358_v19 }
  0x41   :  { %425 = vmatmul.msk.f32.gmra.mxu0 %vm44_vm0, %v39_v11 }
  0x86   :  { %v561_v12 = vpop.f32.mrf.mxu0 }
  0x87   :  { %v133_v20 = vmul.f32 %v561_v12, %v561_v12 }
  0x8e   :  { %v563_v13 = vpop.f32.mrf.mxu0 }
  0x8f   :  { %v134_v18 = vmul.f32 %v563_v13, %v563_v13  ;;  %v112_v21 = vadd.f32 %v563_v13, %v561_v12 }
  0x91   :  { %v141_v23 = vadd.f32 %v134_v18, %v133_v20  ;;  %v203_v20 = vld [vmem:[%s808_s4 + $0x8] sm:$0xff] }
  0x92   :  { %232 = vmatpush.msra.mxu1 %v203_v20  ;;  %440 = vmatpush.msra.mxu3 %v203_v20 }
  0x96   :  { %v565_v14 = vpop.f32.mrf.mxu0 }
  0x97   :  { %v135_v22 = vmul.f32 %v565_v14, %v565_v14  ;;  %v113_v24 = vadd.f32 %v112_v21, %v565_v14 }
  0x99   :  { %v142_v29 = vadd.f32 %v141_v23, %v135_v22  ;;  %v202_v22 = vld [vmem:[%s808_s4] sm:$0xff] }
  0x9a   :  { %233 = vmatpush.msra.mxu1 %v202_v22  ;;  %441 = vmatpush.msra.mxu3 %v202_v22 }
  0x9c   :  { %442 = vmatpush.msrb.mxu3 %v359_v10 }
  0x9e   :  { %v567_v15 = vpop.f32.mrf.mxu0  ;;  %443 = vmatpush.msrb.mxu3 %v358_v19 }
  0x9f   :  { %v136_v25 = vmul.f32 %v567_v15, %v567_v15  ;;  %v114_v30 = vadd.f32 %v113_v24, %v567_v15 }
  0xa1   :  { %v143_v33 = vadd.f32 %v142_v29, %v136_v25 }
  0xa6   :  { %v569_v16 = vpop.f32.mrf.mxu0 }
  0xa7   :  { %v137_v31 = vmul.f32 %v569_v16, %v569_v16  ;;  %v115_v34 = vadd.f32 %v114_v30, %v569_v16 }
  0xa9   :  { %v144_v38 = vadd.f32 %v143_v33, %v137_v31  ;;  %v110_v31 = vld [vmem:[%s809_s2] sm:$0x1] }
  0xae   :  { %v571_v17 = vpop.f32.mrf.mxu0 }
  0xaf   :  { %v138_v35 = vmul.f32 %v571_v17, %v571_v17  ;;  %v116_v39 = vadd.f32 %v115_v34, %v571_v17 }
  0xb1   :  { %v145_v42 = vadd.f32 %v144_v38, %v138_v35  ;;  %v111_v35 = vld [vmem:[%s810_s3] sm:$0x1] }
  0xb6   :  { %v587_v27 = vpop.f32.mrf.mxu0 }
  0xb7   :  { %v139_v40 = vmul.f32 %v587_v27, %v587_v27  ;;  %v117_v43 = vadd.f32 %v116_v39, %v587_v27 }
  0xb9   :  { %v146_v47 = vadd.f32 %v145_v42, %v139_v40 }
  0xbe   :  { %v611_v45 = vpop.f32.mrf.mxu0 }
  0xbf   :  { %v118_v48 = vadd.f32 %v117_v43, %v611_v45  ;;  %v140_v49 = vmul.f32 %v611_v45, %v611_v45 }
  0xc1   :  { %v119_v51 = vrot.slane %v118_v48, 4  ;;  %v147_v52 = vadd.f32 %v146_v47, %v140_v49 }
  0xc3   :  { %v120_v55 = vadd.f32 %v119_v51, %v118_v48  ;;  %v148_v56 = vrot.slane %v147_v52, 4 }
  0xc5   :  { %v121_v58 = vrot.slane %v120_v55, 2  ;;  %v149_v59 = vadd.f32 %v148_v56, %v147_v52 }
  0xc7   :  { %v122_v62 = vadd.f32 %v121_v58, %v120_v55  ;;  %v150_v63 = vrot.slane %v149_v59, 2 }
  0xc9   :  { %v123_v1 = vrot.slane %v122_v62, 1  ;;  %v151_v2 = vadd.f32 %v150_v63, %v149_v59 }
  0xcb   :  { %v124_v5 = vadd.f32 %v123_v1, %v122_v62  ;;  %v152_v6 = vrot.slane %v151_v2, 1 }
  0xcd   :  { %v132_v8 = vmul.f32 %v634_v4, %v124_v5  ;;  %v153_v9 = vadd.f32 %v152_v6, %v151_v2 }
  0xcf   :  { %v154_v11 = vmul.f32 %v153_v9, %v634_v4  ;;  %v155_v18 = vmul.f32 %v132_v8, %v132_v8 }
  0xd1   :  { %v156_v21 = vsub.f32 %v154_v11, %v155_v18 }
  0xd3   :  { %v157_v23 = vmax.f32 %v156_v21, 0.0 }
  0xd5   :  { %v158_v24 = vadd.f32 1e-05, %v157_v23 }
  0xd7   :  { %462 = vrsqrt.f32 %v158_v24  ;;  %vm165_vm3 = vweird.f32 %v158_v24 }
  0xdd   :  { %v463_v25 = vpop.eup %462 }
  0xde   :  { %v160_v26 = vmul.f32 %v463_v25, %v158_v24  ;;  %vm166_vm2 = vweird.f32 %v463_v25  ;;  %v357_v24 = vld [vmem:[%s812_s7 + $0x68] sm:$0xff] }
  0xdf   :  { %vm167_vm4 = vmor %vm165_vm3, %vm166_vm2  ;;  %366 = vmatpush.msra.mxu2 %v357_v24  ;;  %444 = vmatpush.msrb.mxu3 %v357_v24 }
  0xe0   :  { %v161_v28 = vmul.f32 %v463_v25, %v160_v26 }
  0xe2   :  { %v162_v29 = vmul.f32 0.5, %v161_v28 }
  0xe4   :  { %v163_v30 = vsub.f32 1.5, %v162_v29 }
  0xe6   :  { %v164_v32 = vmul.f32 %v463_v25, %v163_v30  ;;  %v356_v30 = vld [vmem:[%s812_s7 + $0x60] sm:$0xff] }
  0xe7   :  { %367 = vmatpush.msra.mxu2 %v356_v30  ;;  %445 = vmatpush.msrb.mxu3 %v356_v30 }
  0xe8   :  { %v168_v33 = vsel %vm167_vm4, %v463_v25, %v164_v32 }
  0xe9   :  { %v169_v34 = vmul.f32 %v168_v33, %v110_v31 }
  0xeb   :  { %v170_v36 = vmul.f32 %v169_v34, %v132_v8  ;;  %v173_v37 = vperm.slane %v169_v34, 0  ;;  %v355_v34 = vld [vmem:[%s812_s7 + $0x58] sm:$0xff] }
  0xec   :  { %368 = vmatpush.msra.mxu2 %v355_v34  ;;  %446 = vmatpush.msrb.mxu3 %v355_v34 }
  0xed   :  { %v171_v38 = vsub.f32 %v111_v35, %v170_v36  ;;  %v175_v40 = vmul.f32 %v173_v37, %v561_v12  ;;  %v181_v41 = vmul.f32 %v173_v37, %v587_v27  ;;  %v182_v47 = vmul.f32 %v173_v37, %v611_v45 }
  0xee   :  { %v176_v48 = vmul.f32 %v173_v37, %v563_v13  ;;  %v177_v12 = vmul.f32 %v173_v37, %v565_v14  ;;  %v178_v54 = vmul.f32 %v173_v37, %v567_v15  ;;  %v179_v45 = vmul.f32 %v173_v37, %v569_v16 }
  0xef   :  { %v184_v39 = vperm.slane %v171_v38, 0  ;;  %v180_v58 = vmul.f32 %v173_v37, %v571_v17  ;;  %v354_v37 = vld [vmem:[%s812_s7 + $0x50] sm:$0xff] }
  0xf0   :  { %369 = vmatpush.msra.mxu2 %v354_v37  ;;  %447 = vmatpush.msrb.mxu3 %v354_v37 }
  0xf1   :  { %v186_v42 = vadd.f32 %v184_v39, %v175_v40  ;;  %v192_v43 = vadd.f32 %v184_v39, %v181_v41  ;;  %v187_v49 = vadd.f32 %v184_v39, %v176_v48  ;;  %v193_v50 = vadd.f32 %v184_v39, %v182_v47  ;;  %v353_v40 = vld [vmem:[%s812_s7 + $0x48] sm:$0xff]  ;;  %v351_v47 = vld [vmem:[%s812_s7 + $0x38] sm:$0xff] }
  0xf2   :  { %v188_v53 = vadd.f32 %v184_v39, %v177_v12  ;;  %v189_v55 = vadd.f32 %v184_v39, %v178_v54  ;;  %v190_v57 = vadd.f32 %v184_v39, %v179_v45  ;;  %v191_v59 = vadd.f32 %v184_v39, %v180_v58  ;;  %370 = vmatpush.msra.mxu2 %v353_v40  ;;  %v349_v12 = vld [vmem:[%s812_s7 + $0x28] sm:$0xff]  ;;  %v348_v54 = vld [vmem:[%s812_s7 + $0x20] sm:$0xff]  ;;  %v347_v45 = vld [vmem:[%s812_s7 + $0x18] sm:$0xff] }
  0xf3   :  { %v194_v44 = vmax.f32 %v186_v42, 0.0  ;;  %v200_v46 = vmax.f32 %v192_v43, 0.0  ;;  %v195_v51 = vmax.f32 %v187_v49, 0.0  ;;  %v201_v52 = vmax.f32 %v193_v50, 0.0  ;;  %448 = vmatpush.msrb.mxu3 %v353_v40  ;;  %v352_v43 = vld [vmem:[%s812_s7 + $0x40] sm:$0xff]  ;;  %v350_v50 = vld [vmem:[%s812_s7 + $0x30] sm:$0xff] }
  0xf4   :  { %v196_v27 = vmax.f32 %v188_v53, 0.0  ;;  %v197_v56 = vmax.f32 %v189_v55, 0.0  ;;  %v198_v13 = vmax.f32 %v190_v57, 0.0  ;;  %v199_v60 = vmax.f32 %v191_v59, 0.0  ;;  %371 = vmatpush.msra.mxu2 %v352_v43  ;;  %v346_v57 = vld [vmem:[%s812_s7 + $0x10] sm:$0xff]  ;;  %v345_v58 = vld [vmem:[%s812_s7 + $0x8] sm:$0xff] }
  0xf5   :  { %234 = vmatmul.f32.vlgmr.msra.gmra.mxu1 %v194_v44  ;;  %252 = vmatmul.f32.vlgmr.msra.gmra.mxu3 %v200_v46 }
  0xf6   :  { %449 = vmatpush.msrb.mxu3 %v352_v43  ;;  %372 = vmatpush.msra.mxu2 %v351_v47 }
  0xf8   :  { %450 = vmatpush.msrb.mxu3 %v351_v47  ;;  %373 = vmatpush.msra.mxu2 %v350_v50 }
  0xfa   :  { %451 = vmatpush.msrb.mxu3 %v350_v50  ;;  %374 = vmatpush.msra.mxu2 %v349_v12 }
  0xfc   :  { %452 = vmatpush.msrb.mxu3 %v349_v12  ;;  %375 = vmatpush.msra.mxu2 %v348_v54 }
  0xfd   :  { %237 = vmatmul.f32.gmra.mxu1 %v195_v51  ;;  %255 = vmatmul.f32.gmra.mxu3 %v201_v52 }
  0xfe   :  { %453 = vmatpush.msrb.mxu3 %v348_v54  ;;  %376 = vmatpush.msra.mxu2 %v347_v45 }
 0x100   :  { %454 = vmatpush.msrb.mxu3 %v347_v45  ;;  %377 = vmatpush.msra.mxu2 %v346_v57 }
 0x102   :  { %455 = vmatpush.msrb.mxu3 %v346_v57  ;;  %378 = vmatpush.msra.mxu2 %v345_v58 }
 0x104   :  { %456 = vmatpush.msrb.mxu3 %v345_v58 }
 0x105   :  { %240 = vmatmul.f32.gmra.mxu1 %v196_v27 }
 0x10d   :  { %243 = vmatmul.f32.gmra.mxu1 %v197_v56 }
 0x115   :  { %246 = vmatmul.f32.gmra.mxu1 %v198_v13 }
 0x11d   :  { %249 = vmatmul.f32.gmra.mxu1 %v199_v60 }
 0x172   :  { %v667_v61 = vpop.f32.mrf.mxu1 }
 0x173   :  { %v275_v17 = vmul.f32 %v667_v61, %v667_v61 }
 0x178   :  { %v677_v16 = vpop.f32.mrf.mxu3 }
 0x179   :  { %v281_v26 = vmul.f32 %v677_v16, %v677_v16 }
 0x17a   :  { %v669_v14 = vpop.f32.mrf.mxu1 }
 0x17b   :  { %v276_v63 = vmul.f32 %v669_v14, %v669_v14  ;;  %v261_v1 = vadd.f32 %v669_v14, %v667_v61 }
 0x17d   :  { %v283_v3 = vadd.f32 %v276_v63, %v275_v17 }
 0x180   :  { %v708_v25 = vpop.f32.mrf.mxu3 }
 0x181   :  { %v282_v31 = vmul.f32 %v708_v25, %v708_v25 }
 0x182   :  { %v671_v62 = vpop.f32.mrf.mxu1 }
 0x183   :  { %v277_v2 = vmul.f32 %v671_v62, %v671_v62  ;;  %v262_v5 = vadd.f32 %v261_v1, %v671_v62 }
 0x185   :  { %v284_v7 = vadd.f32 %v283_v3, %v277_v2 }
 0x18a   :  { %v673_v15 = vpop.f32.mrf.mxu1 }
 0x18b   :  { %v278_v6 = vmul.f32 %v673_v15, %v673_v15  ;;  %v263_v8 = vadd.f32 %v262_v5, %v673_v15  ;;  %v259_v5 = vld [vmem:[%s813_s5] sm:$0x1] }
 0x18d   :  { %v285_v11 = vadd.f32 %v284_v7, %v278_v6 }
 0x192   :  { %v679_v0 = vpop.f32.mrf.mxu1 }
 0x193   :  { %v279_v9 = vmul.f32 %v679_v0, %v679_v0  ;;  %v264_v18 = vadd.f32 %v263_v8, %v679_v0 }
 0x195   :  { %v286_v21 = vadd.f32 %v285_v11, %v279_v9  ;;  %v260_v9 = vld [vmem:[%s814_s6] sm:$0x1] }
 0x19a   :  { %v700_v20 = vpop.f32.mrf.mxu1 }
 0x19b   :  { %v265_v22 = vadd.f32 %v264_v18, %v700_v20  ;;  %v280_v23 = vmul.f32 %v700_v20, %v700_v20 }
 0x19d   :  { %v266_v28 = vadd.f32 %v265_v22, %v677_v16  ;;  %v287_v29 = vadd.f32 %v286_v21, %v280_v23 }
 0x19f   :  { %v267_v32 = vadd.f32 %v266_v28, %v708_v25  ;;  %v288_v33 = vadd.f32 %v287_v29, %v281_v26 }
 0x1a1   :  { %v268_v35 = vrot.slane %v267_v32, 4  ;;  %v289_v36 = vadd.f32 %v288_v33, %v282_v31 }
 0x1a3   :  { %v269_v38 = vadd.f32 %v268_v35, %v267_v32  ;;  %v290_v39 = vrot.slane %v289_v36, 4 }
 0x1a5   :  { %v270_v41 = vrot.slane %v269_v38, 2  ;;  %v291_v42 = vadd.f32 %v290_v39, %v289_v36 }
 0x1a7   :  { %v271_v44 = vadd.f32 %v270_v41, %v269_v38  ;;  %v292_v46 = vrot.slane %v291_v42, 2 }
 0x1a9   :  { %v272_v48 = vrot.slane %v271_v44, 1  ;;  %v293_v49 = vadd.f32 %v292_v46, %v291_v42 }
 0x1ab   :  { %v273_v51 = vadd.f32 %v272_v48, %v271_v44  ;;  %v294_v52 = vrot.slane %v293_v49, 1 }
 0x1ad   :  { %v274_v53 = vmul.f32 %v273_v51, %v634_v4  ;;  %v295_v27 = vadd.f32 %v294_v52, %v293_v49 }
 0x1af   :  { %v296_v55 = vmul.f32 %v295_v27, %v634_v4  ;;  %v297_v56 = vmul.f32 %v274_v53, %v274_v53  ;;  %v344_v4 = vld [vmem:[%s812_s7] sm:$0xff] }
 0x1b0   :  { %379 = vmatpush.msra.mxu2 %v344_v4  ;;  %457 = vmatpush.msrb.mxu3 %v344_v4 }
 0x1b1   :  { %v298_v13 = vsub.f32 %v296_v55, %v297_v56 }
 0x1b3   :  { %v299_v59 = vmax.f32 %v298_v13, 0.0 }
 0x1b5   :  { %v300_v60 = vadd.f32 1e-05, %v299_v59 }
 0x1b7   :  { %464 = vrsqrt.f32 %v300_v60  ;;  %vm307_vm6 = vweird.f32 %v300_v60 }
 0x1bd   :  { %v465_v63 = vpop.eup %464 }
 0x1be   :  { %v302_v17 = vmul.f32 %v465_v63, %v300_v60  ;;  %vm308_vm5 = vweird.f32 %v465_v63 }
 0x1bf   :  { %vm309_vm7 = vmor %vm307_vm6, %vm308_vm5 }
 0x1c0   :  { %v303_v1 = vmul.f32 %v465_v63, %v302_v17 }
 0x1c2   :  { %v304_v2 = vmul.f32 0.5, %v303_v1 }
 0x1c4   :  { %v305_v3 = vsub.f32 1.5, %v304_v2 }
 0x1c6   :  { %v306_v6 = vmul.f32 %v465_v63, %v305_v3 }
 0x1c8   :  { %v310_v7 = vsel %vm309_vm7, %v465_v63, %v306_v6 }
 0x1c9   :  { %v311_v8 = vmul.f32 %v310_v7, %v259_v5 }
 0x1cb   :  { %v312_v10 = vmul.f32 %v311_v8, %v274_v53  ;;  %v315_v11 = vperm.slane %v311_v8, 0 }
 0x1cd   :  { %v313_v18 = vsub.f32 %v260_v9, %v312_v10  ;;  %v317_v21 = vmul.f32 %v315_v11, %v667_v61  ;;  %v323_v22 = vmul.f32 %v315_v11, %v677_v16  ;;  %v318_v29 = vmul.f32 %v315_v11, %v669_v14 }
 0x1ce   :  { %v324_v30 = vmul.f32 %v315_v11, %v708_v25  ;;  %v319_v61 = vmul.f32 %v315_v11, %v671_v62  ;;  %v320_v36 = vmul.f32 %v315_v11, %v673_v15  ;;  %v321_v14 = vmul.f32 %v315_v11, %v679_v0  ;;  %v459_v62 = vld [vmem:[%s811_s8] ss:$0 sm:$0xff] }
 0x1cf   :  { %v326_v19 = vperm.slane %v313_v18, 0  ;;  %v322_v40 = vmul.f32 %v315_v11, %v700_v20 }
 0x1d1   :  { %v328_v23 = vadd.f32 %v326_v19, %v317_v21  ;;  %v334_v24 = vadd.f32 %v326_v19, %v323_v22  ;;  %v329_v31 = vadd.f32 %v326_v19, %v318_v29  ;;  %v335_v32 = vadd.f32 %v326_v19, %v324_v30 }
 0x1d2   :  { %v330_v35 = vadd.f32 %v326_v19, %v319_v61  ;;  %v331_v37 = vadd.f32 %v326_v19, %v320_v36  ;;  %v332_v39 = vadd.f32 %v326_v19, %v321_v14  ;;  %v333_v41 = vadd.f32 %v326_v19, %v322_v40 }
 0x1d3   :  { %v336_v26 = vmax.f32 %v328_v23, 0.0  ;;  %v342_v28 = vmax.f32 %v334_v24, 0.0  ;;  %v337_v33 = vmax.f32 %v329_v31, 0.0  ;;  %v343_v34 = vmax.f32 %v335_v32, 0.0 }
 0x1d4   :  { %v338_v16 = vmax.f32 %v330_v35, 0.0  ;;  %v339_v38 = vmax.f32 %v331_v37, 0.0  ;;  %v340_v25 = vmax.f32 %v332_v39, 0.0  ;;  %v341_v42 = vmax.f32 %v333_v41, 0.0 }
 0x1d5   :  { %380 = vmatmul.f32.vlgmr.msra.gmra.mxu2 %v336_v26  ;;  %398 = vmatmul.f32.vlgmr.msrb.gmra.mxu3 %v342_v28 }
 0x1dd   :  { %383 = vmatmul.f32.gmra.mxu2 %v337_v33  ;;  %401 = vmatmul.f32.gmra.mxu3 %v343_v34 }
 0x1e5   :  { %386 = vmatmul.f32.gmra.mxu2 %v338_v16 }
 0x1ed   :  { %389 = vmatmul.f32.gmra.mxu2 %v339_v38 }
 0x1f5   :  { %392 = vmatmul.f32.gmra.mxu2 %v340_v25 }
 0x1fd   :  { %395 = vmatmul.f32.gmra.mxu2 %v341_v42 }
 0x258   :  { %v381_v43 = vpop.f32.mrf.mxu2  ;;  %v399_v15 = vpop.f32.mrf.mxu3 }
 0x259   :  { %v382_v44 = vadd.f32 %v459_v62, %v381_v43  ;;  %v400_v46 = vadd.f32 %v459_v62, %v399_v15 }
 0x25b   :  { %406 = vst.msk [vmem:[%s815_s9] sm:$0xff] %vm405_vm8, %v382_v44 }
 0x25c   :  { %412 = vst.msk [vmem:[%s815_s9 + $0x30] sm:$0xff] %vm405_vm8, %v400_v46 }
 0x260   :  { %v384_v0 = vpop.f32.mrf.mxu2  ;;  %v402_v20 = vpop.f32.mrf.mxu3 }
 0x261   :  { %v385_v47 = vadd.f32 %v459_v62, %v384_v0  ;;  %v403_v48 = vadd.f32 %v459_v62, %v402_v20 }
 0x263   :  { %407 = vst.msk [vmem:[%s815_s9 + $0x8] sm:$0xff] %vm405_vm8, %v385_v47 }
 0x264   :  { %413 = vst.msk [vmem:[%s815_s9 + $0x38] sm:$0xff] %vm405_vm8, %v403_v48 }
 0x268   :  { %v387_v49 = vpop.f32.mrf.mxu2 }
 0x269   :  { %v388_v50 = vadd.f32 %v459_v62, %v387_v49 }
 0x26b   :  { %408 = vst.msk [vmem:[%s815_s9 + $0x10] sm:$0xff] %vm405_vm8, %v388_v50 }
 0x270   :  { %v390_v51 = vpop.f32.mrf.mxu2 }
 0x271   :  { %v391_v52 = vadd.f32 %v459_v62, %v390_v51 }
 0x273   :  { %409 = vst.msk [vmem:[%s815_s9 + $0x18] sm:$0xff] %vm405_vm8, %v391_v52 }
 0x278   :  { %v393_v12 = vpop.f32.mrf.mxu2 }
 0x279   :  { %v394_v53 = vadd.f32 %v459_v62, %v393_v12 }
 0x27b   :  { %410 = vst.msk [vmem:[%s815_s9 + $0x20] sm:$0xff] %vm405_vm8, %v394_v53 }
 0x280   :  { %v396_v27 = vpop.f32.mrf.mxu2 }
 0x281   :  { %v397_v54 = vadd.f32 %v459_v62, %v396_v27 }
 0x283   :  { %411 = vst.msk [vmem:[%s815_s9 + $0x28] sm:$0xff] %vm405_vm8, %v397_v54 }

</bundles_post_ra>
